<compile_context>
chip_gen: v7x
topology: tpu7x:2x2x1
jax: 0.10.0
libtpu: 0.0.40
codegen_flags: <defaults>
</compile_context>

<pallas_src>
import functools

import jax
import jax.numpy as jnp
from jax import lax
from jax.experimental import pallas as pl
from jax.experimental.pallas import tpu as pltpu

SMOOTH = 1.0

# Per-input HBM->VMEM block budget (bytes of the input dtype).
_BLOCK_BUDGET_BYTES = 6 * 1024 * 1024
# Bound on each f32 upcast temporary inside the kernel (per chunk).
_CHUNK_BUDGET_BYTES = 1 * 1024 * 1024


def _dice_kernel(p_ref, t_ref, out_ref, acc_pt_ref, acc_s_ref, *,
                 h_total, tile_h, chunk_rows, need_mask):
    """Accumulate partial sums of p*t and p+t for one batch block.

    Grid = (batch_blocks, h_tiles).  Per batch block i: reset the small
    accumulators at the first H-tile, fold every H-tile into them with pure
    VALU adds, and emit (intersection, p+t) partials at the last H-tile.
    """
    j = pl.program_id(1)

    @pl.when(j == 0)
    def _():
        acc_pt_ref[...] = jnp.zeros_like(acc_pt_ref)
        acc_s_ref[...] = jnp.zeros_like(acc_s_ref)

    bn, th, w = p_ref.shape                 # channel dim already squeezed away
    fold = (th % 8 == 0)                    # static

    part_pt = jnp.zeros(acc_pt_ref.shape, jnp.float32)
    part_s = jnp.zeros(acc_s_ref.shape, jnp.float32)

    # Static (unrolled) chunk loop: keeps the f32 temporaries ~chunk-sized
    # while the DMA'd block stays large (low per-grid-step overhead).
    for r0 in range(0, th, chunk_rows):
        r1 = min(r0 + chunk_rows, th)
        p = p_ref[:, r0:r1, :].astype(jnp.float32)
        t = t_ref[:, r0:r1, :].astype(jnp.float32)

        if need_mask:
            # Ragged last H-tile: zero out-of-range rows (zeros are
            # sum-neutral), applied before any arithmetic.
            rows_left = h_total - j * tile_h
            rid = r0 + lax.broadcasted_iota(jnp.int32, p.shape, 1)
            ok = rid < rows_left
            p = jnp.where(ok, p, 0.0)
            t = jnp.where(ok, t, 0.0)

        pt = p * t                          # intersection partials (VPU only)
        s = p + t                           # fused sum(p)+sum(t) partials

        if fold:
            # Fold (bn, rows) into sublane groups of 8 and reduce over the
            # group axis: vreg-to-vreg VALU adds, no XLU, tiny (8, W) result.
            part_pt += pt.reshape(-1, 8, w).sum(axis=0)
            part_s += s.reshape(-1, 8, w).sum(axis=0)
        else:
            # Odd H (< one sublane multiple): plane-shaped accumulator,
            # reduce over the batch axis only.  Only reachable when the whole
            # (small) plane fits a single block.
            part_pt += pt.sum(axis=0)
            part_s += s.sum(axis=0)

    acc_pt_ref[...] += part_pt
    acc_s_ref[...] += part_s

    @pl.when(j == pl.num_programs(1) - 1)
    def _():
        out_ref[0, 0] = jnp.sum(acc_pt_ref[...])
        out_ref[0, 1] = jnp.sum(acc_s_ref[...])


def dice_loss(y_pred, y_true, *, block_budget_bytes=_BLOCK_BUDGET_BYTES):
    assert y_pred.shape == y_true.shape
    n, _, h, w = y_pred.shape
    esize = max(y_pred.dtype.itemsize, y_true.dtype.itemsize)

    plane_bytes = h * w * esize
    if plane_bytes <= block_budget_bytes:
        # Whole channel-0 plane(s) per block; pick the largest batch block
        # (a divisor of N) that fits the per-input VMEM budget.
        th = h
        fold = (h % 8 == 0)
        # Non-fold (odd-H) planes keep a plane-shaped accumulator, so cap the
        # block harder to keep temporaries + accumulators comfortably in VMEM.
        budget = block_budget_bytes if fold else min(block_budget_bytes,
                                                     2 * 1024 * 1024)
        bn = 1
        for d in range(n, 0, -1):
            if n % d == 0 and d * plane_bytes <= budget:
                bn = d
                break
        n_h = 1
    else:
        # Large plane: tile H inside the kernel.  th must be a multiple of 8;
        # full-extent W is always a legal last block dim (no W%128 needed).
        # TODO(synk): pathological rows wider than the budget (w*esize*8 >
        # budget) still use an 8-row block and may exceed the budget.
        bn = 1
        th = max(8, (block_budget_bytes // (w * esize)) // 8 * 8)
        fold = True
        n_h = pl.cdiv(h, th)

    need_mask = (h % th) != 0

    if fold:
        acc_shape = (8, w)
        chunk_rows = (_CHUNK_BUDGET_BYTES // (bn * w * 4)) // 8 * 8
        chunk_rows = min(max(8, chunk_rows), th)
    else:
        acc_shape = (th, w)
        chunk_rows = th

    nb = n // bn
    grid = (nb, n_h)

    kernel = functools.partial(_dice_kernel, h_total=h, tile_h=th,
                               chunk_rows=chunk_rows, need_mask=need_mask)

    # Squeezed channel dim selects channel 0 directly from the NCHW layout.
    in_spec = pl.BlockSpec((bn, None, th, w), lambda i, j: (i, 0, j, 0))

    partials = pl.pallas_call(
        kernel,
        out_shape=jax.ShapeDtypeStruct((nb, 2), jnp.float32),
        grid=grid,
        in_specs=[in_spec, in_spec],
        out_specs=pl.BlockSpec((1, 2), lambda i, j: (i, 0),
                               memory_space=pltpu.SMEM),
        scratch_shapes=[pltpu.VMEM(acc_shape, jnp.float32),
                        pltpu.VMEM(acc_shape, jnp.float32)],
        compiler_params=pltpu.CompilerParams(
            # Batch-block axis is independent (per-block partial outputs) so
            # it can be sharded across v7x's two TensorCores; the H-tile axis
            # is the sequential reduction.
            dimension_semantics=("parallel", "arbitrary"),
            vmem_limit_bytes=32 * 1024 * 1024),
    )(y_pred, y_true)

    # Tiny combine + dice formula (negligible XLA ops on an (nb, 2) array).
    inter = jnp.sum(partials[:, 0])
    denom = jnp.sum(partials[:, 1])
    return 1.0 - (2.0 * inter + SMOOTH) / (denom + SMOOTH)


def _dice_loss_ref(y_pred, y_true):
    p = y_pred[:, 0].reshape(-1).astype(jnp.float32)
    t = y_true[:, 0].reshape(-1).astype(jnp.float32)
    inter = jnp.sum(p * t)
    dsc = (2.0 * inter + SMOOTH) / (jnp.sum(p) + jnp.sum(t) + SMOOTH)
    return 1.0 - dsc


if __name__ == "__main__":
    key = jax.random.PRNGKey(0)
    k1, k2, k3, k4, k5, k6 = jax.random.split(key, 6)

    # Primary test: small NCHW shape consistent with the module.
    y_pred = jax.random.uniform(k1, (2, 4, 16, 16), dtype=jnp.float32)
    y_true = (jax.random.uniform(k2, (2, 4, 16, 16)) > 0.5).astype(jnp.float32)
    loss = jax.block_until_ready(dice_loss(y_pred, y_true))
    ref = jax.block_until_ready(_dice_loss_ref(y_pred, y_true))
    assert jnp.allclose(loss, ref, atol=1e-5, rtol=1e-5), (loss, ref)

    # Exercise the in-kernel H-tiled path (incl. ragged-tile masking and the
    # multi-batch-block partial outputs) at a tiny size via a small budget.
    y_pred2 = jax.random.uniform(k3, (2, 3, 20, 128), dtype=jnp.float32)
    y_true2 = (jax.random.uniform(k4, (2, 3, 20, 128)) > 0.5).astype(jnp.float32)
    loss2 = jax.block_until_ready(
        dice_loss(y_pred2, y_true2, block_budget_bytes=4096))
    ref2 = jax.block_until_ready(_dice_loss_ref(y_pred2, y_true2))
    assert jnp.allclose(loss2, ref2, atol=1e-5, rtol=1e-5), (loss2, ref2)

    # Exercise the odd-H (non-sublane-multiple) single-block path.
    y_pred3 = jax.random.uniform(k5, (2, 2, 10, 16), dtype=jnp.float32)
    y_true3 = (jax.random.uniform(k6, (2, 2, 10, 16)) > 0.5).astype(jnp.float32)
    loss3 = jax.block_until_ready(dice_loss(y_pred3, y_true3))
    ref3 = jax.block_until_ready(_dice_loss_ref(y_pred3, y_true3))
    assert jnp.allclose(loss3, ref3, atol=1e-5, rtol=1e-5), (loss3, ref3)

    print("KERNEL_OK")
</pallas_src>

<mosaic_0001>
module attributes {stable_mosaic.version = 11 : i64} {
  func.func @_dice_kernel(%arg0: i32, %arg1: i32, %arg2: memref<2x1x16x16xf32, #tpu.memory_space<vmem>>, %arg3: memref<2x1x16x16xf32, #tpu.memory_space<vmem>>, %arg4: memref<1x2xf32, #tpu.memory_space<smem>>, %arg5: memref<8x16xf32, #tpu.memory_space<vmem>>, %arg6: memref<8x16xf32, #tpu.memory_space<vmem>>) attributes {dimension_semantics = [#tpu.dimension_semantics<parallel>, #tpu.dimension_semantics<arbitrary>], iteration_bounds = array<i64: 1, 1>, scalar_prefetch = 0 : i64, scratch_operands = 2 : i64, tpu.core_type = #tpu.core_type<tc>, window_params = [{transform_indices = @transform_0, window_bounds = array<i64: 2, 1, 16, 16>}, {transform_indices = @transform_1, window_bounds = array<i64: 2, 1, 16, 16>}, {transform_indices = @transform_2, window_bounds = array<i64: 1, 2>}]} {
    %c0_i32 = arith.constant 0 : i32
    %0 = arith.cmpi eq, %arg1, %c0_i32 : i32
    %1 = arith.extui %0 : i1 to i32
    %c0_i32_0 = arith.constant 0 : i32
    %2 = arith.cmpi ne, %1, %c0_i32_0 : i32
    scf.if %2 {
      %cst_21 = arith.constant 0.000000e+00 : f32
      %26 = vector.broadcast %cst_21 : f32 to vector<8x16xf32>
      %c0_22 = arith.constant 0 : index
      %c0_23 = arith.constant 0 : index
      %27 = vector.load %arg5[%c0_22, %c0_23] : memref<8x16xf32, #tpu.memory_space<vmem>>, vector<8x16xf32>
      tpu.vector_store %arg5[%c0_22, %c0_23], %26 {strides = array<i32>} : memref<8x16xf32, #tpu.memory_space<vmem>>, vector<8x16xf32>,
      %cst_24 = arith.constant 0.000000e+00 : f32
      %28 = vector.broadcast %cst_24 : f32 to vector<8x16xf32>
      %c0_25 = arith.constant 0 : index
      %c0_26 = arith.constant 0 : index
      %29 = vector.load %arg6[%c0_25, %c0_26] : memref<8x16xf32, #tpu.memory_space<vmem>>, vector<8x16xf32>
      tpu.vector_store %arg6[%c0_25, %c0_26], %28 {strides = array<i32>} : memref<8x16xf32, #tpu.memory_space<vmem>>, vector<8x16xf32>,
    } else {
    }
    %cst = arith.constant 0.000000e+00 : f32
    %3 = vector.broadcast %cst : f32 to vector<8x16xf32>
    %cst_1 = arith.constant 0.000000e+00 : f32
    %4 = vector.broadcast %cst_1 : f32 to vector<8x16xf32>
    %c0 = arith.constant 0 : index
    %c0_2 = arith.constant 0 : index
    %c0_3 = arith.constant 0 : index
    %c0_4 = arith.constant 0 : index
    %5 = vector.load %arg2[%c0, %c0_2, %c0_3, %c0_4] : memref<2x1x16x16xf32, #tpu.memory_space<vmem>>, vector<2x1x16x16xf32>
    %6 = vector.shape_cast %5 : vector<2x1x16x16xf32> to vector<2x16x16xf32>
    %c0_5 = arith.constant 0 : index
    %c0_6 = arith.constant 0 : index
    %c0_7 = arith.constant 0 : index
    %c0_8 = arith.constant 0 : index
    %7 = vector.load %arg3[%c0_5, %c0_6, %c0_7, %c0_8] : memref<2x1x16x16xf32, #tpu.memory_space<vmem>>, vector<2x1x16x16xf32>
    %8 = vector.shape_cast %7 : vector<2x1x16x16xf32> to vector<2x16x16xf32>
    %9 = arith.mulf %6, %8 : vector<2x16x16xf32>
    %10 = arith.addf %6, %8 : vector<2x16x16xf32>
    %11 = vector.shape_cast %9 : vector<2x16x16xf32> to vector<4x8x16xf32>
    %cst_9 = arith.constant dense<0.000000e+00> : vector<8x16xf32>
    %12 = vector.multi_reduction <add>, %11, %cst_9 [0] : vector<4x8x16xf32> to vector<8x16xf32>
    %13 = arith.addf %3, %12 : vector<8x16xf32>
    %14 = vector.shape_cast %10 : vector<2x16x16xf32> to vector<4x8x16xf32>
    %cst_10 = arith.constant dense<0.000000e+00> : vector<8x16xf32>
    %15 = vector.multi_reduction <add>, %14, %cst_10 [0] : vector<4x8x16xf32> to vector<8x16xf32>
    %16 = arith.addf %4, %15 : vector<8x16xf32>
    %c0_11 = arith.constant 0 : index
    %c0_12 = arith.constant 0 : index
    %17 = vector.load %arg5[%c0_11, %c0_12] : memref<8x16xf32, #tpu.memory_space<vmem>>, vector<8x16xf32>
    %18 = arith.addf %17, %13 : vector<8x16xf32>
    %c0_13 = arith.constant 0 : index
    %c0_14 = arith.constant 0 : index
    %19 = vector.load %arg5[%c0_13, %c0_14] : memref<8x16xf32, #tpu.memory_space<vmem>>, vector<8x16xf32>
    tpu.vector_store %arg5[%c0_13, %c0_14], %18 {strides = array<i32>} : memref<8x16xf32, #tpu.memory_space<vmem>>, vector<8x16xf32>,
    %c0_15 = arith.constant 0 : index
    %c0_16 = arith.constant 0 : index
    %20 = vector.load %arg6[%c0_15, %c0_16] : memref<8x16xf32, #tpu.memory_space<vmem>>, vector<8x16xf32>
    %21 = arith.addf %20, %16 : vector<8x16xf32>
    %c0_17 = arith.constant 0 : index
    %c0_18 = arith.constant 0 : index
    %22 = vector.load %arg6[%c0_17, %c0_18] : memref<8x16xf32, #tpu.memory_space<vmem>>, vector<8x16xf32>
    tpu.vector_store %arg6[%c0_17, %c0_18], %21 {strides = array<i32>} : memref<8x16xf32, #tpu.memory_space<vmem>>, vector<8x16xf32>,
    %c0_i32_19 = arith.constant 0 : i32
    %23 = arith.cmpi eq, %arg1, %c0_i32_19 : i32
    %24 = arith.extui %23 : i1 to i32
    %c0_i32_20 = arith.constant 0 : i32
    %25 = arith.cmpi ne, %24, %c0_i32_20 : i32
    scf.if %25 {
      %c0_21 = arith.constant 0 : index
      %c0_22 = arith.constant 0 : index
      %26 = vector.load %arg5[%c0_21, %c0_22] : memref<8x16xf32, #tpu.memory_space<vmem>>, vector<8x16xf32>
      %27 = vector.shape_cast %26 : vector<8x16xf32> to vector<1x8x16xf32>
      %cst_23 = arith.constant dense<0.000000e+00> : vector<1xf32>
      %28 = vector.multi_reduction <add>, %27, %cst_23 [1, 2] : vector<1x8x16xf32> to vector<1xf32>
      %29 = vector.shape_cast %28 : vector<1xf32> to vector<1x1x1xf32>
      %30 = vector.extract %29[0, 0, 0] : f32 from vector<1x1x1xf32>
      %c0_24 = arith.constant 0 : index
      %c0_25 = arith.constant 0 : index
      %31 = memref.load %arg4[%c0_24, %c0_25] : memref<1x2xf32, #tpu.memory_space<smem>>
      memref.store %30, %arg4[%c0_24, %c0_25] : memref<1x2xf32, #tpu.memory_space<smem>>
      %c0_26 = arith.constant 0 : index
      %c0_27 = arith.constant 0 : index
      %32 = vector.load %arg6[%c0_26, %c0_27] : memref<8x16xf32, #tpu.memory_space<vmem>>, vector<8x16xf32>
      %33 = vector.shape_cast %32 : vector<8x16xf32> to vector<1x8x16xf32>
      %cst_28 = arith.constant dense<0.000000e+00> : vector<1xf32>
      %34 = vector.multi_reduction <add>, %33, %cst_28 [1, 2] : vector<1x8x16xf32> to vector<1xf32>
      %35 = vector.shape_cast %34 : vector<1xf32> to vector<1x1x1xf32>
      %36 = vector.extract %35[0, 0, 0] : f32 from vector<1x1x1xf32>
      %c0_29 = arith.constant 0 : index
      %c1 = arith.constant 1 : index
      %37 = memref.load %arg4[%c0_29, %c1] : memref<1x2xf32, #tpu.memory_space<smem>>
      memref.store %36, %arg4[%c0_29, %c1] : memref<1x2xf32, #tpu.memory_space<smem>>
    } else {
    }
    return
  }
  func.func @transform_0(%arg0: i32, %arg1: i32) -> (i32, i32, i32, i32) {
    %c0_i32 = arith.constant 0 : i32
    %c0_i32_0 = arith.constant 0 : i32
    %c0_i32_1 = arith.constant 0 : i32
    return %arg0, %c0_i32, %arg1, %c0_i32_0 : i32, i32, i32, i32
  }
  func.func @transform_1(%arg0: i32, %arg1: i32) -> (i32, i32, i32, i32) {
    %c0_i32 = arith.constant 0 : i32
    %c0_i32_0 = arith.constant 0 : i32
    %c0_i32_1 = arith.constant 0 : i32
    return %arg0, %c0_i32, %arg1, %c0_i32_0 : i32, i32, i32, i32
  }
  func.func @transform_2(%arg0: i32, %arg1: i32) -> (i32, i32) {
    %c0_i32 = arith.constant 0 : i32
    %c0_i32_0 = arith.constant 0 : i32
    return %arg0, %c0_i32 : i32, i32
  }
}

</mosaic_0001>

<bundles_post_ra>
// kernel: tpu_custom_call.1
= control target key start
LH: loop header
LB: loop body
LE: loop exit
PB: predicated region body
PF: predicated region fallthrough
CT: control target
= control target key end

     0   :  { %7 = vsyncpa [#allocation5], 0  ;;  %s287_s0 = inlined_call_operand.hbm [shape: f32[2,4,16,16], index: 0, kind: input, shape index: {}]   ;;  %s288_s1 = inlined_call_operand.hbm [shape: f32[2,4,16,16], index: 1, kind: input, shape index: {}]   ;;  %s289_s2 = inlined_call_operand.hbm [shape: f32[1,2], index: 2, kind: output, shape index: {}]  }
   0x1   :  { %8 = vsyncpa [#allocation8], 0 }
   0x2   :  { %9 = vsyncpa [#allocation6], 0 }
   0x3   :  { %s19_s9 = sld [smem:[#allocation0]]   ;;  %s222_s10 = smov [#allocation4]  }
   0x4   :  { %s27_s11 = sshll.u32 %s222_s10, 4  ;;  %s223_s12 = smov 1024   ;;  %s28_s11 = int_to_ptr.vmem [resolvable:$true] %s27_s11 }
   0x5   :  { %34 = sst [smem:[#allocation11]] %s223_s12  ;;  %s224_s13 = smov 256  }
   0x6   :  { %36 = sst [smem:[#allocation11 + $0x1]] %s224_s13  ;;  %s225_s14 = smov 2  }
   0x7   :  { %38 = sst [smem:[#allocation11 + $0x2]] %s225_s14  ;;  %s226_s16 = smov 128  }
   0x8   :  { %40 = sst [smem:[#allocation11 + $0x3]] %s226_s16  ;;  %s227_s18 = smov 8  }
   0x9   :  { %s180_s15 = sshll.u32 %s19_s9, 26  ;;  %42 = sst [smem:[#allocation11 + $0x4]] %s226_s16 }
   0xa   :  { %s181_s17 = sadd.s32 134217728, %s180_s15  ;;  %44 = sst [smem:[#allocation11 + $0x5]] %s227_s18 }
   0xb   :  { %s228_s19 = smov [#allocation5]   ;;  %s229_s20 = smov [#allocation10]  }
   0xc   :  { %46 = dma.general %s287_s0, 512, %s28_s11, %s228_s19, %s229_s20, [#allocation11], %s181_s17, 0  }
   0xd   :  { %s56_s23 = sld [smem:[#allocation0]]   ;;  %s230_s24 = smov [#allocation7]  }
   0xe   :  { %s64_s25 = sshll.u32 %s230_s24, 4  ;;  %s231_s26 = smov 1024   ;;  %s65_s25 = int_to_ptr.vmem [resolvable:$true] %s64_s25 }
   0xf   :  { %71 = sst [smem:[#allocation13]] %s231_s26  ;;  %s232_s27 = smov 256  }
  0x10   :  { %73 = sst [smem:[#allocation13 + $0x1]] %s232_s27  ;;  %s233_s28 = smov 2  }
  0x11   :  { %75 = sst [smem:[#allocation13 + $0x2]] %s233_s28  ;;  %s234_s30 = smov 128  }
  0x12   :  { %77 = sst [smem:[#allocation13 + $0x3]] %s234_s30  ;;  %s235_s4 = smov 8  }
  0x13   :  { %s182_s29 = sshll.u32 %s56_s23, 26  ;;  %79 = sst [smem:[#allocation13 + $0x4]] %s234_s30 }
  0x14   :  { %s183_s3 = sadd.s32 134217728, %s182_s29  ;;  %81 = sst [smem:[#allocation13 + $0x5]] %s235_s4 }
  0x15   :  { %s236_s5 = smov [#allocation8]   ;;  %s237_s6 = smov [#allocation12]  }
  0x16   :  { %83 = dma.general %s288_s1, 512, %s65_s25, %s236_s5, %s237_s6, [#allocation13], %s183_s3, 0  }
  0x17   :  { %216 = dma.done.wait [#allocation5], 512  }
  0x18   :  { %217 = vsyncadd [#allocation5], 4294966784 }
  0x19   :  { %218 = dma.done.wait [#allocation8], 512  }
  0x1a   :  { %219 = vsyncadd [#allocation8], 4294966784  ;;  %vm94_vm0 = vcmask 130048   ;;  %v238_v0 = vmov 0.0   ;;  %v97_v1 = vld [vmem:[#allocation4] sm:$0xff]  ;;  %v98_v2 = vld [vmem:[#allocation4 + $0x8] sm:$0xff] }
  0x1b   :  { %95 = vst.msk [vmem:[#allocation2] sm:$0xff] %vm94_vm0, %v238_v0  ;;  %96 = vst.msk [vmem:[#allocation3] sm:$0xff] %vm94_vm0, %v238_v0  ;;  %v99_v3 = vld [vmem:[#allocation4 + $0x10] sm:$0xff]  ;;  %v100_v4 = vld [vmem:[#allocation4 + $0x18] sm:$0xff]  ;;  %s206_s11 = scalar_lea.hbm %s289_s2, 16 }
  0x1c   :  { %v101_v5 = vld [vmem:[#allocation7] sm:$0xff]  ;;  %v102_v6 = vld [vmem:[#allocation7 + $0x8] sm:$0xff]  ;;  %v103_v7 = vld [vmem:[#allocation7 + $0x10] sm:$0xff]  ;;  %p207_p0 = scmp.ne.s32.totalorder %s289_s2, %s206_s11  ;;  %p210_p1 = scmp.lt.u32.totalorder %s206_s11, %s289_s2 }
  0x1d   :  { %v104_v8 = vld [vmem:[#allocation7 + $0x18] sm:$0xff]  ;;  %v105_v9 = vmul.f32 %v101_v5, %v97_v1  ;;  %v106_v10 = vmul.f32 %v102_v6, %v98_v2  ;;  %v109_v11 = vadd.f32 %v101_v5, %v97_v1  ;;  %v110_v12 = vadd.f32 %v102_v6, %v98_v2 }
  0x1e   :  { %v107_v13 = vmul.f32 %v103_v7, %v99_v3  ;;  %v108_v14 = vmul.f32 %v104_v8, %v100_v4  ;;  %v111_v15 = vadd.f32 %v103_v7, %v99_v3  ;;  %v112_v16 = vadd.f32 %v104_v8, %v100_v4  ;;  %p212_p2 = pnand %p210_p1, %p207_p0 }
  0x1f   :  { %v114_v17 = vsel %vm94_vm0, %v105_v9, 0.0  ;;  %v115_v18 = vsel %vm94_vm0, %v106_v10, 0.0  ;;  %v122_v19 = vsel %vm94_vm0, %v109_v11, 0.0  ;;  %v123_v20 = vsel %vm94_vm0, %v110_v12, 0.0 }
  0x20   :  { %v116_v21 = vadd.f32 %v115_v18, %v114_v17  ;;  %v117_v22 = vsel %vm94_vm0, %v107_v13, 0.0  ;;  %v124_v23 = vadd.f32 %v123_v20, %v122_v19  ;;  %v119_v24 = vsel %vm94_vm0, %v108_v14, 0.0 }
  0x21   :  { %v125_v25 = vsel %vm94_vm0, %v111_v15, 0.0  ;;  %v127_v26 = vsel %vm94_vm0, %v112_v16, 0.0 }
  0x22   :  { %v118_v27 = vadd.f32 %v117_v22, %v116_v21  ;;  %v126_v28 = vadd.f32 %v125_v25, %v124_v23  ;;  %v130_v29 = vld [vmem:[#allocation2] sm:$0xff]  ;;  %v133_v30 = vld [vmem:[#allocation3] sm:$0xff] }
  0x24   :  { %v120_v31 = vadd.f32 %v119_v24, %v118_v27  ;;  %v128_v32 = vadd.f32 %v127_v26, %v126_v28 }
  0x26   :  { %v131_v33 = vadd.f32 %v130_v29, %v120_v31  ;;  %v134_v34 = vadd.f32 %v133_v30, %v128_v32 }
  0x28   :  { %132 = vst.msk [vmem:[#allocation2] sm:$0xff] %vm94_vm0, %v131_v33  ;;  %135 = vst.msk [vmem:[#allocation3] sm:$0xff] %vm94_vm0, %v134_v34 }
  0x2f   :  { %v139_v35 = vld [vmem:[#allocation2] sm:$0xff]  ;;  %v152_v36 = vld [vmem:[#allocation3] sm:$0xff] }
  0x30   :  { %v140_v37 = vsel %vm94_vm0, %v139_v35, 0.0  ;;  %v153_v38 = vsel %vm94_vm0, %v152_v36, 0.0 }
  0x31   :  { %141 = vadd.xlane.f32.xlu0 %v140_v37 }
  0x35   :  { %154 = vadd.xlane.f32.xlu0 %v153_v38 }
  0xbe   :  { %v142_v39 = vpop.xlane.xlu0 %141 }
  0xbf   :  { %v143_v40 = vrot.slane %v142_v39, 4 }
  0xc1   :  { %v144_v41 = vadd.f32 %v143_v40, %v142_v39 }
  0xc2   :  { %v155_v42 = vpop.xlane.xlu0 %154 }
  0xc3   :  { %v145_v43 = vrot.slane %v144_v41, 2  ;;  %v156_v44 = vrot.slane %v155_v42, 4 }
  0xc5   :  { %v157_v45 = vadd.f32 %v156_v44, %v155_v42  ;;  %v146_v46 = vadd.f32 %v145_v43, %v144_v41 }
  0xc7   :  { %v158_v47 = vrot.slane %v157_v45, 2  ;;  %v147_v48 = vrot.slane %v146_v46, 1 }
  0xc9   :  { %v159_v49 = vadd.f32 %v158_v47, %v157_v45  ;;  %v148_v50 = vadd.f32 %v147_v48, %v146_v46 }
  0xcb   :  { %184 = vpush %v148_v50  ;;  %v160_v51 = vrot.slane %v159_v49, 1 }
  0xcd   :  { %v161_v52 = vadd.f32 %v160_v51, %v159_v49 }
  0xcf   :  { %186 = vpush %v161_v52 }
  0xfc   :  { %s185_s1 = spop %184 }
  0xfd   :  { %151 = sst [smem:[#allocation9]] %s185_s1 }
 0x100   :  { %s187_s8 = spop %186 }
 0x101   :  { %164 = sst [smem:[#allocation9 + $0x1]] %s187_s8 }
 0x102   :  { %215 = shalt.err (!%p212_p2)
}
 0x103   :  { %s239_s16 = smov [#allocation9]  }
 0x104   :  { %172 = dma.smem_to_hbm %s239_s16, 16, %s289_s2, [#allocation6]  }
 0x105   :  { %220 = dma.done.wait [#allocation6], 16  }
 0x106   :  { %221 = vsyncadd [#allocation6], 4294967280 }
 0x107   :  { %176 = sfence }
 0x108   :  { %177 = vsyncpa [#allocation5], 1 }
 0x109   :  { %178 = vsyncpa [#allocation8], 1 }
 0x10a   :  { %179 = vsyncpa [#allocation6], 1 }

</bundles_post_ra>
